<compile_context>
chip_gen: v7x
topology: tpu7x:2x2x1
jax: 0.10.0
libtpu: 0.0.40
codegen_flags: <defaults>
</compile_context>

<pallas_src>
import jax
import jax.numpy as jnp
from jax.experimental import pallas as pl
from jax.experimental.pallas import tpu as pltpu

_LANES = 128
_P = 2  # partial accumulators for focal_sum (lets v7x's 2 TCs split the grid)


def _round_up(x, m):
    return ((x + m - 1) // m) * m


def _gamma_is_small_int(gamma):
    g = float(gamma)
    return g.is_integer() and 0.0 <= g <= 8.0


def _chip_budgets():
    """Generation-aware tile/VMEM budgets (v5e/v6e: 128 MiB VMEM, v7x: 64 MiB)."""
    try:
        cap = int(getattr(pltpu.get_tpu_info(), "vmem_capacity_bytes", 0) or 0)
    except Exception:
        cap = 0
    if cap >= 96 * 1024 * 1024:            # v5e / v6e class (128 MiB VMEM)
        return {"focal_tile_bytes": 8 << 20,
                "reg_tile_bytes": 4 << 20,
                "vmem_limit": 80 << 20}
    # v7x class (64 MiB per TC) or unknown -> conservative
    return {"focal_tile_bytes": 4 << 20,
            "reg_tile_bytes": 2 << 20,
            "vmem_limit": 48 << 20}


def _choose_tile_n(n, c, focal_tile_bytes):
    """Rows per tile, sized on f32 row-bytes so in-kernel f32 temporaries stay
    bounded regardless of input dtype.  No row cap: small-C problems get big
    tiles and amortize the ~0.35us per-grid-step overhead."""
    tn = max(8, focal_tile_bytes // (c * 4))
    tn = min(tn, _round_up(n, 8))
    return max(8, (tn // 8) * 8)


# ---------------------------------------------------------------------------
# shared per-row focal math (operates on one (TN, C) tile, returns (TN, 1))
# ---------------------------------------------------------------------------
def _per_sample_focal(x, t, alpha, gamma, gamma_is_int, bf16_exp):
    x = x.astype(jnp.float32)                                      # (TN, C)
    tn, c = x.shape
    # numerically stable log-sum-exp along the class (lane) axis
    m = jnp.max(x, axis=-1, keepdims=True)
    xm = x - m
    if bf16_exp:
        # bf16 EUP exp (v6e/v7x) with f32 lane-sum accumulation; only taken
        # when the inputs themselves are bf16, so precision matches the data.
        e = jnp.exp(xm.astype(jnp.bfloat16)).astype(jnp.float32)
    else:
        e = jnp.exp(xm)
    lse = m + jnp.log(jnp.sum(e, axis=-1, keepdims=True))
    # gather target logit via lane-iota one-hot compare (no dynamic gather)
    col = jax.lax.broadcasted_iota(jnp.int32, (tn, c), 1)
    x_t = jnp.sum(jnp.where(col == t, x, 0.0), axis=-1, keepdims=True)
    ce = jnp.maximum(lse - x_t, 0.0)                               # clamp rounding negatives
    pt = jnp.exp(-ce)
    omp = 1.0 - pt
    if gamma_is_int:
        g = int(round(float(gamma)))
        if g == 0:
            w = jnp.ones_like(omp)
        else:
            w = omp
            for _ in range(g - 1):                                 # VALU multiplies, no EUP pow
                w = w * omp
    else:
        w = jnp.power(jnp.maximum(omp, 0.0), jnp.float32(gamma))
    return alpha * w * ce                                          # (TN, 1)


# ---------------------------------------------------------------------------
# Kernel 1a: fused focal-loss SUM (for 'mean'/'sum'), 2-way partial parallel
# ---------------------------------------------------------------------------
def _focal_sum_kernel(alpha, gamma, gamma_is_int, n_valid, bf16_exp):
    def kernel(x_ref, t_ref, acc_ref):
        p = pl.program_id(0)
        t = pl.program_id(1)
        tiles_per_part = pl.num_programs(1)
        g = p * tiles_per_part + t                    # logical row-tile index

        @pl.when(t == 0)
        def _():
            acc_ref[...] = jnp.zeros_like(acc_ref)

        focal = _per_sample_focal(x_ref[...], t_ref[...], alpha, gamma,
                                  gamma_is_int, bf16_exp)
        tn = focal.shape[0]
        # Only ragged / excess tiles pay the row mask (gated with pl.when).
        need_mask = (g + 1) * tn > n_valid

        @pl.when(jnp.logical_not(need_mask))
        def _():
            acc_ref[...] += jnp.sum(focal)

        @pl.when(need_mask)
        def _():
            row = jax.lax.broadcasted_iota(jnp.int32, (tn, 1), 0) + g * tn
            acc_ref[...] += jnp.sum(jnp.where(row < n_valid, focal, 0.0))

    return kernel


def focal_sum(logits, targets, *, alpha=1.0, gamma=2.0):
    n, c = logits.shape
    cfg = _chip_budgets()
    tn = _choose_tile_n(n, c, cfg["focal_tile_bytes"])
    n_tiles = pl.cdiv(n, tn)
    t_per_p = pl.cdiv(n_tiles, _P)
    last = n_tiles - 1
    t2d = targets.astype(jnp.int32).reshape(n, 1)     # no logits/targets padding

    def in_map(p, t):
        # clamp so excess partial tiles never index a fully OOB block; the
        # logical row mask in the kernel zeroes their contribution anyway.
        return (jnp.minimum(p * t_per_p + t, last), 0)

    out = pl.pallas_call(
        _focal_sum_kernel(float(alpha), float(gamma), _gamma_is_small_int(gamma),
                          n, logits.dtype == jnp.bfloat16),
        out_shape=jax.ShapeDtypeStruct((1, _P * _LANES), jnp.float32),
        grid=(_P, t_per_p),
        in_specs=[
            pl.BlockSpec((tn, c), in_map),            # logits tile (input dtype through DMA)
            pl.BlockSpec((tn, 1), in_map),            # targets tile
        ],
        out_specs=pl.BlockSpec((1, _LANES), lambda p, t: (0, p)),  # per-partial resident acc
        compiler_params=pltpu.CompilerParams(
            dimension_semantics=("parallel", "arbitrary"),
            vmem_limit_bytes=cfg["vmem_limit"],
        ),
    )(logits, t2d)
    # every lane of a partial holds the same value; combine the _P partials
    return jnp.sum(out.reshape(_P, _LANES)[:, 0])


# ---------------------------------------------------------------------------
# Kernel 1b: per-sample focal loss (reduction='none'), lane-dense output
# ---------------------------------------------------------------------------
def _focal_none_kernel(alpha, gamma, gamma_is_int, bf16_exp):
    def kernel(x_ref, t_ref, out_ref):
        focal = _per_sample_focal(x_ref[...], t_ref[...], alpha, gamma,
                                  gamma_is_int, bf16_exp)
        tn = focal.shape[0]
        # (tn,1) column -> (1,1,tn) lane-dense row (XLU relayout; store is a
        # full, unmasked lane-dense vst instead of a width-1 masked store)
        out_ref[...] = jnp.reshape(focal, (1, 1, tn))

    return kernel


def focal_per_sample(logits, targets, *, alpha=1.0, gamma=2.0):
    n, c = logits.shape
    cfg = _chip_budgets()
    tn = _choose_tile_n(n, c, cfg["focal_tile_bytes"])
    n_tiles = pl.cdiv(n, tn)
    t2d = targets.astype(jnp.int32).reshape(n, 1)     # no padding of inputs

    out = pl.pallas_call(
        _focal_none_kernel(float(alpha), float(gamma), _gamma_is_small_int(gamma),
                           logits.dtype == jnp.bfloat16),
        out_shape=jax.ShapeDtypeStruct((n_tiles, 1, tn), jnp.float32),
        grid=(n_tiles,),
        in_specs=[
            pl.BlockSpec((tn, c), lambda i: (i, 0)),
            pl.BlockSpec((tn, 1), lambda i: (i, 0)),
        ],
        out_specs=pl.BlockSpec((1, 1, tn), lambda i: (i, 0, 0)),
        compiler_params=pltpu.CompilerParams(
            dimension_semantics=("parallel",),        # independent row tiles
            vmem_limit_bytes=cfg["vmem_limit"],
        ),
    )(logits, t2d)
    # garbage in the ragged tail (OOB input reads) is sliced away here
    return out.reshape(-1)[:n]


# ---------------------------------------------------------------------------
# Kernel 2: streaming |x|-sum / x^2-sum over one parameter tensor
# ---------------------------------------------------------------------------
def _param_norm_kernel(r_valid, needs_mask):
    def kernel(p_ref, l1_ref, sq_ref):
        i = pl.program_id(0)

        @pl.when(i == 0)
        def _():
            l1_ref[...] = jnp.zeros_like(l1_ref)
            sq_ref[...] = jnp.zeros_like(sq_ref)

        p = p_ref[...].astype(jnp.float32)            # (tile_r, 128)
        if needs_mask:                                # only when rows don't divide evenly
            tr = p.shape[0]
            row = jax.lax.broadcasted_iota(jnp.int32, p.shape, 0) + i * tr
            p = jnp.where(row < r_valid, p, 0.0)
        l1_ref[...] += jnp.sum(jnp.abs(p), keepdims=True)
        sq_ref[...] += jnp.sum(p * p, keepdims=True)

    return kernel


def _l1_sq_one_param(p, reg_tile_bytes, vmem_limit):
    f = jnp.ravel(p)
    n = int(f.shape[0])
    if n == 0:
        return jnp.float32(0.0), jnp.float32(0.0)
    n_pad = _round_up(n, _LANES)                      # at most 127 extra elements
    if n_pad != n:
        f = jnp.pad(f, (0, n_pad - n))                # zeros: no effect on |x| / x^2
    data = f.reshape(-1, _LANES)                      # keep original dtype through DMA
    r = data.shape[0]
    max_tr = max(8, reg_tile_bytes // (_LANES * 4))
    if r <= max_tr:
        tile_r = r                                    # single full block
    else:
        tile_r = (max_tr // 8) * 8
    grid = pl.cdiv(r, tile_r)
    needs_mask = (r % tile_r) != 0

    l1, sq = pl.pallas_call(
        _param_norm_kernel(r, needs_mask),
        out_shape=(jax.ShapeDtypeStruct((1, 1), jnp.float32),
                   jax.ShapeDtypeStruct((1, 1), jnp.float32)),
        grid=(grid,),
        in_specs=[pl.BlockSpec((tile_r, _LANES), lambda i: (i, 0))],
        out_specs=(pl.BlockSpec((1, 1), lambda i: (0, 0)),
                   pl.BlockSpec((1, 1), lambda i: (0, 0))),
        compiler_params=pltpu.CompilerParams(
            dimension_semantics=("arbitrary",),       # resident accumulators
            vmem_limit_bytes=vmem_limit,
        ),
    )(data)
    return l1[0, 0], sq[0, 0]


def param_norms(model_params):
    """Returns (sum_p ||p||_1, sum_p ||p||_2) with one streaming call per param."""
    if not model_params:
        return jnp.float32(0.0), jnp.float32(0.0)
    # TODO(synk): batch many tiny params (biases, LN scales) into one call to
    # amortize the per-pallas_call launch overhead for very deep models.
    cfg = _chip_budgets()
    l1s, l2s = [], []
    for p in model_params:
        l1, sq = _l1_sq_one_param(p, cfg["reg_tile_bytes"], cfg["vmem_limit"])
        l1s.append(l1)
        l2s.append(jnp.sqrt(sq))                      # per-param Frobenius norm
    return jnp.sum(jnp.stack(l1s)), jnp.sum(jnp.stack(l2s))


# ---------------------------------------------------------------------------
# FocalLoss forward (matches the PyTorch module semantics)
# ---------------------------------------------------------------------------
def focal_loss(inputs, targets, model_params, *, alpha=1.0, gamma=2.0,
               reduction="mean", l1_lambda=1e-5, l2_lambda=1e-4):
    n, _ = inputs.shape
    l1_reg, l2_reg = param_norms(model_params)
    reg = l1_lambda * l1_reg + l2_lambda * l2_reg

    if reduction in ("mean", "sum"):
        total = focal_sum(inputs, targets, alpha=alpha, gamma=gamma)
        if reduction == "mean":
            total = total / jnp.float32(n)
        return total + reg
    # 'none': scalar reg is broadcast-added to every per-sample loss, exactly
    # as in the PyTorch module (focal_loss + scalar tensors).
    return focal_per_sample(inputs, targets, alpha=alpha, gamma=gamma) + reg


# ---------------------------------------------------------------------------
# Pure-JAX reference
# ---------------------------------------------------------------------------
def _ref_focal_loss(inputs, targets, model_params, *, alpha=1.0, gamma=2.0,
                    reduction="mean", l1_lambda=1e-5, l2_lambda=1e-4):
    x = inputs.astype(jnp.float32)
    lse = jax.scipy.special.logsumexp(x, axis=-1)
    ce = lse - jnp.take_along_axis(x, targets[:, None].astype(jnp.int32), axis=-1)[:, 0]
    pt = jnp.exp(-ce)
    focal = alpha * (1.0 - pt) ** gamma * ce
    l1 = sum(jnp.sum(jnp.abs(p)) for p in model_params)
    l2 = sum(jnp.sqrt(jnp.sum(p.astype(jnp.float32) ** 2)) for p in model_params)
    reg = l1_lambda * l1 + l2_lambda * l2
    if reduction == "mean":
        return jnp.mean(focal) + reg
    if reduction == "sum":
        return jnp.sum(focal) + reg
    return focal + reg


if __name__ == "__main__":
    key = jax.random.PRNGKey(0)
    k1, k2, k3, k4 = jax.random.split(key, 4)

    N, C = 8, 16
    logits = jax.random.normal(k1, (N, C), dtype=jnp.float32)
    targets = jax.random.randint(k2, (N,), 0, C, dtype=jnp.int32)

    # deterministic synthetic "model params" (a small linear layer)
    w = jax.random.normal(k3, (32, 16), dtype=jnp.float32) * 0.1
    b = jax.random.normal(k4, (16,), dtype=jnp.float32) * 0.1
    model_params = [w, b]

    # default path: reduction='mean' (fused in-kernel partial sums)
    loss_mean = focal_loss(logits, targets, model_params,
                           alpha=1.0, gamma=2.0, reduction="mean",
                           l1_lambda=1e-5, l2_lambda=1e-4)
    loss_mean = jax.block_until_ready(loss_mean)
    ref_mean = _ref_focal_loss(logits, targets, model_params, reduction="mean")
    assert jnp.allclose(loss_mean, ref_mean, rtol=1e-5, atol=1e-5), (loss_mean, ref_mean)

    # 'sum' reduction (same fused kernel)
    loss_sum = jax.block_until_ready(
        focal_loss(logits, targets, model_params, reduction="sum"))
    ref_sum = _ref_focal_loss(logits, targets, model_params, reduction="sum")
    assert jnp.allclose(loss_sum, ref_sum, rtol=1e-5, atol=1e-5), (loss_sum, ref_sum)

    # 'none' reduction (per-sample kernel, lane-dense output)
    loss_none = jax.block_until_ready(
        focal_loss(logits, targets, model_params, reduction="none"))
    ref_none = _ref_focal_loss(logits, targets, model_params, reduction="none")
    assert jnp.allclose(loss_none, ref_none, rtol=1e-5, atol=1e-5), (loss_none, ref_none)

    print("KERNEL_OK")
</pallas_src>

<mosaic_0001>
module attributes {stable_mosaic.version = 11 : i64} {
  func.func @kernel(%arg0: i32, %arg1: memref<4x128xf32, #tpu.memory_space<vmem>>, %arg2: memref<1x1xf32, #tpu.memory_space<vmem>>, %arg3: memref<1x1xf32, #tpu.memory_space<vmem>>) attributes {dimension_semantics = [#tpu.dimension_semantics<arbitrary>], iteration_bounds = array<i64: 1>, scalar_prefetch = 0 : i64, scratch_operands = 0 : i64, tpu.core_type = #tpu.core_type<tc>, window_params = [{transform_indices = @transform_0, window_bounds = array<i64: 4, 128>}, {pipeline_mode = #tpu.pipeline_mode<synchronous>, transform_indices = @transform_1, window_bounds = array<i64: 1, 1>}, {pipeline_mode = #tpu.pipeline_mode<synchronous>, transform_indices = @transform_2, window_bounds = array<i64: 1, 1>}]} {
    %c0_i32 = arith.constant 0 : i32
    %0 = arith.cmpi eq, %arg0, %c0_i32 : i32
    %1 = arith.extui %0 : i1 to i32
    %c0_i32_0 = arith.constant 0 : i32
    %2 = arith.cmpi ne, %1, %c0_i32_0 : i32
    scf.if %2 {
      %cst_11 = arith.constant 0.000000e+00 : f32
      %22 = vector.broadcast %cst_11 : f32 to vector<1x1xf32>
      %c0_12 = arith.constant 0 : index
      %c0_13 = arith.constant 0 : index
      %23 = vector.load %arg2[%c0_12, %c0_13] : memref<1x1xf32, #tpu.memory_space<vmem>>, vector<1x1xf32>
      tpu.vector_store %arg2[%c0_12, %c0_13], %22 {strides = array<i32>} : memref<1x1xf32, #tpu.memory_space<vmem>>, vector<1x1xf32>,
      %cst_14 = arith.constant 0.000000e+00 : f32
      %24 = vector.broadcast %cst_14 : f32 to vector<1x1xf32>
      %c0_15 = arith.constant 0 : index
      %c0_16 = arith.constant 0 : index
      %25 = vector.load %arg3[%c0_15, %c0_16] : memref<1x1xf32, #tpu.memory_space<vmem>>, vector<1x1xf32>
      tpu.vector_store %arg3[%c0_15, %c0_16], %24 {strides = array<i32>} : memref<1x1xf32, #tpu.memory_space<vmem>>, vector<1x1xf32>,
    } else {
    }
    %c0 = arith.constant 0 : index
    %c0_1 = arith.constant 0 : index
    %3 = vector.load %arg1[%c0, %c0_1] : memref<4x128xf32, #tpu.memory_space<vmem>>, vector<4x128xf32>
    %c0_2 = arith.constant 0 : index
    %c0_3 = arith.constant 0 : index
    %4 = vector.load %arg2[%c0_2, %c0_3] : memref<1x1xf32, #tpu.memory_space<vmem>>, vector<1x1xf32>
    %5 = math.absf %3 : vector<4x128xf32>
    %6 = vector.shape_cast %5 : vector<4x128xf32> to vector<1x4x128xf32>
    %cst = arith.constant dense<0.000000e+00> : vector<1xf32>
    %7 = vector.multi_reduction <add>, %6, %cst [1, 2] : vector<1x4x128xf32> to vector<1xf32>
    %8 = vector.shape_cast %7 : vector<1xf32> to vector<1x1x1xf32>
    %9 = vector.extract %8[0, 0, 0] : f32 from vector<1x1x1xf32>
    %10 = vector.broadcast %9 : f32 to vector<1x1xf32>
    %11 = arith.addf %4, %10 : vector<1x1xf32>
    %c0_4 = arith.constant 0 : index
    %c0_5 = arith.constant 0 : index
    %12 = vector.load %arg2[%c0_4, %c0_5] : memref<1x1xf32, #tpu.memory_space<vmem>>, vector<1x1xf32>
    tpu.vector_store %arg2[%c0_4, %c0_5], %11 {strides = array<i32>} : memref<1x1xf32, #tpu.memory_space<vmem>>, vector<1x1xf32>,
    %c0_6 = arith.constant 0 : index
    %c0_7 = arith.constant 0 : index
    %13 = vector.load %arg3[%c0_6, %c0_7] : memref<1x1xf32, #tpu.memory_space<vmem>>, vector<1x1xf32>
    %14 = arith.mulf %3, %3 : vector<4x128xf32>
    %15 = vector.shape_cast %14 : vector<4x128xf32> to vector<1x4x128xf32>
    %cst_8 = arith.constant dense<0.000000e+00> : vector<1xf32>
    %16 = vector.multi_reduction <add>, %15, %cst_8 [1, 2] : vector<1x4x128xf32> to vector<1xf32>
    %17 = vector.shape_cast %16 : vector<1xf32> to vector<1x1x1xf32>
    %18 = vector.extract %17[0, 0, 0] : f32 from vector<1x1x1xf32>
    %19 = vector.broadcast %18 : f32 to vector<1x1xf32>
    %20 = arith.addf %13, %19 : vector<1x1xf32>
    %c0_9 = arith.constant 0 : index
    %c0_10 = arith.constant 0 : index
    %21 = vector.load %arg3[%c0_9, %c0_10] : memref<1x1xf32, #tpu.memory_space<vmem>>, vector<1x1xf32>
    tpu.vector_store %arg3[%c0_9, %c0_10], %20 {strides = array<i32>} : memref<1x1xf32, #tpu.memory_space<vmem>>, vector<1x1xf32>,
    return
  }
  func.func @transform_0(%arg0: i32) -> (i32, i32) {
    %c0_i32 = arith.constant 0 : i32
    %c0_i32_0 = arith.constant 0 : i32
    return %arg0, %c0_i32 : i32, i32
  }
  func.func @transform_1(%arg0: i32) -> (i32, i32) {
    %c0_i32 = arith.constant 0 : i32
    %c0_i32_0 = arith.constant 0 : i32
    %c0_i32_1 = arith.constant 0 : i32
    return %c0_i32, %c0_i32_0 : i32, i32
  }
  func.func @transform_2(%arg0: i32) -> (i32, i32) {
    %c0_i32 = arith.constant 0 : i32
    %c0_i32_0 = arith.constant 0 : i32
    %c0_i32_1 = arith.constant 0 : i32
    return %c0_i32, %c0_i32_0 : i32, i32
  }
}

</mosaic_0001>

<bundles_post_ra>
// kernel: tpu_custom_call.1
= control target key start
LH: loop header
LB: loop body
LE: loop exit
PB: predicated region body
PF: predicated region fallthrough
CT: control target
= control target key end

     0   :  { %8 = vsyncpa [#allocation3], 0  ;;  %s232_s0 = inlined_call_operand.hbm [shape: f32[4,128], index: 0, kind: input, shape index: {}]   ;;  %s233_s1 = inlined_call_operand.hbm [shape: f32[1,1], index: 1, kind: output, shape index: {0}]   ;;  %s234_s2 = inlined_call_operand.hbm [shape: f32[1,1], index: 2, kind: output, shape index: {1}]  }
   0x1   :  { %9 = vsyncpa [#allocation4], 0 }
   0x2   :  { %10 = vsyncpa [#allocation7], 0  ;;  %s173_s9 = smov [#allocation2]   ;;  %s101_s13 = scalar_lea.hbm %s232_s0, 64 }
   0x3   :  { %s17_s10 = sshll.u32 %s173_s9, 4  ;;  %p102_p0 = scmp.ne.s32.totalorder %s232_s0, %s101_s13  ;;  %s18_s10 = int_to_ptr.vmem [resolvable:$true] %s17_s10 }
   0x4   :  { %p105_p1 = scmp.lt.u32.totalorder %s101_s13, %s232_s0 }
   0x6   :  { %p107_p2 = pnand %p105_p1, %p102_p0 }
   0x8   :  { %110 = shalt.err (!%p107_p2)
}
   0x9   :  { %s111_s18 = scalar_lea.vmem %s18_s10, 64  ;;  %p116_p4 = scmp.lt.s32.totalorder %s18_s10, %s18_s10 }
   0xa   :  { %p112_p3 = scmp.ne.s32.totalorder %s18_s10, %s111_s18  ;;  %p117_p5 = scmp.lt.s32.totalorder %s111_s18, %s111_s18 }
   0xc   :  { %p118_p6 = por %p117_p5, %p116_p4 }
   0xe   :  { %p119_p7 = pnand %p118_p6, %p112_p3 }
  0x10   :  { %122 = shalt.err (!%p119_p7)
}
  0x11   :  { %20 = dma.hbm_to_vmem [thread:$0]  %s232_s0, 64, %s18_s10, [#allocation3]  }
  0x12   :  { %167 = dma.done.wait [#allocation3], 64  }
  0x13   :  { %168 = vsyncadd [#allocation3], 4294967232  ;;  %vm28_vm0 = vcmask 0   ;;  %v174_v0 = vmov 0.0   ;;  %v31_v1 = vld [vmem:[#allocation2] sm:$0xf] }
  0x14   :  { %29 = vst.msk [vmem:[#allocation5] sm:$0x1] %vm28_vm0, %v174_v0  ;;  %30 = vst.msk [vmem:[#allocation6] sm:$0x1] %vm28_vm0, %v174_v0  ;;  %vm34_vm1 = vcmask 1043456   ;;  %v50_v3 = vmul.f32 %v31_v1, %v31_v1  ;;  %s175_s0 = smov [#allocation5]  }
  0x15   :  { %v33_v2 = vand.u32 2147483647, %v31_v1  ;;  %s70_s21 = sshll.u32 %s175_s0, 4  ;;  %s176_s23 = smov [#allocation6]   ;;  %s71_s21 = int_to_ptr.vmem [resolvable:$true] %s70_s21 }
  0x16   :  { %v51_v5 = vsel %vm34_vm1, %v50_v3, 0.0  ;;  %s80_s24 = sshll.u32 %s176_s23, 4  ;;  %s123_s26 = scalar_lea.vmem %s71_s21, 16  ;;  %s81_s24 = int_to_ptr.vmem [resolvable:$true] %s80_s24 }
  0x17   :  { %v35_v4 = vsel %vm34_vm1, %v33_v2, 0.0  ;;  %p124_p8 = scmp.ne.s32.totalorder %s71_s21, %s123_s26  ;;  %s127_s27 = scalar_lea.vmem %s71_s21, 32 }
  0x18   :  { %36 = vadd.xlane.f32.xlu0 %v35_v4  ;;  %p128_p9 = scmp.lt.s32.totalorder %s71_s21, %s71_s21  ;;  %p129_p10 = scmp.lt.s32.totalorder %s127_s27, %s123_s26 }
  0x1a   :  { %p130_p11 = por %p129_p10, %p128_p9 }
  0x1b   :  { %v32_v20 = vld [vmem:[#allocation5] sm:$0x1]  ;;  %v49_v23 = vld [vmem:[#allocation6] sm:$0x1] }
  0x1c   :  { %52 = vadd.xlane.f32.xlu0 %v51_v5  ;;  %p131_p12 = pnand %p130_p11, %p124_p8 }
  0xa5   :  { %v37_v6 = vpop.xlane.xlu0 %36 }
  0xa6   :  { %v38_v7 = vrot.slane %v37_v6, 4 }
  0xa8   :  { %v39_v8 = vadd.f32 %v38_v7, %v37_v6 }
  0xa9   :  { %v53_v9 = vpop.xlane.xlu0 %52 }
  0xaa   :  { %v40_v10 = vrot.slane %v39_v8, 2  ;;  %v54_v11 = vrot.slane %v53_v9, 4 }
  0xac   :  { %v55_v12 = vadd.f32 %v54_v11, %v53_v9  ;;  %v41_v13 = vadd.f32 %v40_v10, %v39_v8 }
  0xae   :  { %v56_v14 = vrot.slane %v55_v12, 2  ;;  %v42_v15 = vrot.slane %v41_v13, 1 }
  0xb0   :  { %v57_v16 = vadd.f32 %v56_v14, %v55_v12  ;;  %v43_v17 = vadd.f32 %v42_v15, %v41_v13 }
  0xb2   :  { %93 = vpush %v43_v17  ;;  %v58_v18 = vrot.slane %v57_v16, 1 }
  0xb4   :  { %v59_v19 = vadd.f32 %v58_v18, %v57_v16 }
  0xb6   :  { %95 = vpush %v59_v19 }
  0xe3   :  { %s94_s22 = spop %93 }
  0xe4   :  { %v45_v21 = vstv %s94_s22 }
  0xe5   :  { %v46_v22 = vadd.f32 %v45_v21, %v32_v20 }
  0xe7   :  { %48 = vst.msk [vmem:[#allocation5] sm:$0x1] %vm28_vm0, %v46_v22  ;;  %s96_s25 = spop %95 }
  0xe8   :  { %v61_v24 = vstv %s96_s25 }
  0xe9   :  { %134 = shalt.err (!%p131_p12)
}
  0xea   :  { %s135_s30 = scalar_lea.hbm %s233_s1, 16 }
  0xeb   :  { %p136_p13 = scmp.ne.s32.totalorder %s233_s1, %s135_s30  ;;  %p139_p0 = scmp.lt.u32.totalorder %s135_s30, %s233_s1 }
  0xed   :  { %p141_p1 = pnand %p139_p0, %p136_p13 }
  0xef   :  { %144 = shalt.err (!%p141_p1)
}
  0xf0   :  { %73 = dma.vmem_to_hbm [thread:$0]  %s71_s21, 16, %s233_s1, [#allocation4]   ;;  %v62_v25 = vadd.f32 %v61_v24, %v49_v23 }
  0xf1   :  { %s145_s9 = scalar_lea.vmem %s81_s24, 16  ;;  %s149_s10 = scalar_lea.vmem %s81_s24, 32 }
  0xf2   :  { %63 = vst.msk [vmem:[#allocation6] sm:$0x1] %vm28_vm0, %v62_v25  ;;  %p146_p2 = scmp.ne.s32.totalorder %s81_s24, %s145_s9  ;;  %p150_p3 = scmp.lt.s32.totalorder %s81_s24, %s81_s24 }
  0xf3   :  { %p151_p4 = scmp.lt.s32.totalorder %s149_s10, %s145_s9 }
  0xf5   :  { %p152_p5 = por %p151_p4, %p150_p3 }
  0xf7   :  { %p153_p6 = pnand %p152_p5, %p146_p2 }
  0xf9   :  { %156 = shalt.err (!%p153_p6)
}
  0xfa   :  { %s157_s13 = scalar_lea.hbm %s234_s2, 16 }
  0xfb   :  { %p158_p7 = scmp.ne.s32.totalorder %s234_s2, %s157_s13  ;;  %p161_p8 = scmp.lt.u32.totalorder %s157_s13, %s234_s2 }
  0xfd   :  { %p163_p9 = pnand %p161_p8, %p158_p7 }
  0xff   :  { %166 = shalt.err (!%p163_p9)
}
 0x100   :  { %83 = dma.vmem_to_hbm [thread:$0]  %s81_s24, 16, %s234_s2, [#allocation7]  }
 0x101   :  { %169 = dma.done.wait [#allocation4], 16  }
 0x102   :  { %170 = vsyncadd [#allocation4], 4294967280 }
 0x103   :  { %171 = dma.done.wait [#allocation7], 16  }
 0x104   :  { %172 = vsyncadd [#allocation7], 4294967280 }
 0x105   :  { %90 = vsyncpa [#allocation3], 1 }
 0x106   :  { %91 = vsyncpa [#allocation4], 1 }
 0x107   :  { %92 = vsyncpa [#allocation7], 1 }

</bundles_post_ra>
